<compile_context>
chip_gen: v6e
topology: v6e:2x2x1
jax: 0.10.0
libtpu: 0.0.40
codegen_flags: <defaults>
</compile_context>

<pallas_src>
import numpy as np
import jax
import jax.numpy as jnp
from jax.experimental import pallas as pl
from jax.experimental.pallas import tpu as pltpu

LANE = 128


def _wbifpn_add_kernel(w_ref, x_ref, o_ref):
    """w_ref: SMEM (N,) f32 raw weights; x_ref: VMEM (N, tm, 128); o_ref: VMEM (tm, 128)."""
    n = x_ref.shape[0]

    # --- scalar prework (SMEM / sregs) --------------------------------------
    w_relu = [jnp.maximum(w_ref[i], jnp.float32(0.0)) for i in range(n)]
    w_sum = w_relu[0]
    for i in range(1, n):
        w_sum = w_sum + w_relu[i]
    # Module forward divides by sum(relu(w)) with NO epsilon; weights are
    # initialized to 1/N > 0 so the sum is strictly positive in practice.
    inv = jnp.float32(1.0) / w_sum

    # --- weighted sum with normalization folded into the scalar weights -----
    acc = x_ref[0].astype(jnp.float32) * (w_relu[0] * inv)
    for i in range(1, n):
        acc = acc + x_ref[i].astype(jnp.float32) * (w_relu[i] * inv)

    o_ref[...] = acc.astype(o_ref.dtype)


def wbifpn_add(inputs, w):
    """inputs: (N, B, C, H, W) stacked feature maps, w: (N,) learnable weights."""
    n = inputs.shape[0]
    out_shape = inputs.shape[1:]
    dtype = inputs.dtype
    itemsize = jnp.dtype(dtype).itemsize
    total = int(np.prod(out_shape))

    # Lane-dense layout: (N, rows, 128). Pad only if total is not a multiple
    # of 128 — avoids a full HBM copy of the stacked tensor on the common path.
    rem = total % LANE
    if rem:
        x = jnp.pad(inputs.reshape(n, total), ((0, 0), (0, LANE - rem)))
        total_p = total + (LANE - rem)
    else:
        x = inputs.reshape(n, total)
        total_p = total
    rows = total_p // LANE
    x = x.reshape(n, rows, LANE)

    # Row-tile selection: as large as a conservative VMEM budget allows.
    # Resident VMEM ~= 2 buffers * (n inputs + 1 output) * tm * 128 * itemsize.
    sub = 8 * max(1, 4 // itemsize)          # sublane packing: 8 f32, 16 bf16, 32 int8
    vmem_budget = 12 * 1024 * 1024           # safe under v5e/v6e/v7x default scoped VMEM
    cap = vmem_budget // (2 * (n + 1) * LANE * itemsize)
    cap = max(sub, min(2048, (cap // sub) * sub))
    if rows <= cap:
        tm = rows                            # single block; full-dim block is always legal
    else:
        tm = cap                             # multiple of `sub`; partial last block is masked
    grid = (pl.cdiv(rows, tm),)

    out_flat = pl.pallas_call(
        _wbifpn_add_kernel,
        out_shape=jax.ShapeDtypeStruct((rows, LANE), dtype),
        grid_spec=pl.GridSpec(
            grid=grid,
            in_specs=[
                pl.BlockSpec(memory_space=pltpu.SMEM),              # w (N,) untiled in SMEM
                pl.BlockSpec((n, tm, LANE), lambda i: (0, i, 0)),   # stacked input tile
            ],
            out_specs=pl.BlockSpec((tm, LANE), lambda i: (i, 0)),
        ),
        compiler_params=pltpu.CompilerParams(
            dimension_semantics=("parallel",)),                     # lets v7x use both TCs
    )(w.astype(jnp.float32), x)

    if rem:
        return out_flat.reshape(-1)[:total].reshape(out_shape)
    return out_flat.reshape(out_shape)


def wbifpn_add_ref(inputs, w):
    """Pure-JAX reference matching the PyTorch forward exactly."""
    w_relu = jnp.maximum(w, 0.0)
    out = jnp.zeros(inputs.shape[1:], inputs.dtype)
    for i in range(inputs.shape[0]):
        out = out + inputs[i] * w_relu[i]
    return out / jnp.sum(w_relu)


if __name__ == "__main__":
    key = jax.random.PRNGKey(0)

    N = 3                       # number of BiFPN inputs (== input_shape in the module)
    B, C, H, W = 2, 4, 16, 16   # small NCHW feature maps

    inputs = jax.random.normal(key, (N, B, C, H, W), dtype=jnp.float32)

    # Deterministic parameter init exactly like the module: w.data.fill_(1/N)
    w = jnp.full((N,), 1.0 / N, dtype=jnp.float32)

    out = jax.block_until_ready(wbifpn_add(inputs, w))

    ref = wbifpn_add_ref(inputs, w)
    assert out.shape == (B, C, H, W)
    np.testing.assert_allclose(np.asarray(out), np.asarray(ref), rtol=1e-5, atol=1e-5)

    print("KERNEL_OK")
</pallas_src>

<mosaic_0001>
module attributes {stable_mosaic.version = 11 : i64} {
  func.func @_wbifpn_add_kernel(%arg0: i32, %arg1: memref<3xf32, #tpu.memory_space<smem>>, %arg2: memref<3x16x128xf32, #tpu.memory_space<vmem>>, %arg3: memref<16x128xf32, #tpu.memory_space<vmem>>) attributes {dimension_semantics = [#tpu.dimension_semantics<parallel>], iteration_bounds = array<i64: 1>, scalar_prefetch = 0 : i64, scratch_operands = 0 : i64, tpu.core_type = #tpu.core_type<tc>, window_params = [{transform_indices = @transform_0, window_bounds = array<i64: 3>}, {transform_indices = @transform_1, window_bounds = array<i64: 3, 16, 128>}, {transform_indices = @transform_2, window_bounds = array<i64: 16, 128>}]} {
    %c0 = arith.constant 0 : index
    %0 = memref.load %arg1[%c0] : memref<3xf32, #tpu.memory_space<smem>>
    %cst = arith.constant 0.000000e+00 : f32
    %1 = arith.maximumf %0, %cst : f32
    %c1 = arith.constant 1 : index
    %2 = memref.load %arg1[%c1] : memref<3xf32, #tpu.memory_space<smem>>
    %cst_0 = arith.constant 0.000000e+00 : f32
    %3 = arith.maximumf %2, %cst_0 : f32
    %c2 = arith.constant 2 : index
    %4 = memref.load %arg1[%c2] : memref<3xf32, #tpu.memory_space<smem>>
    %cst_1 = arith.constant 0.000000e+00 : f32
    %5 = arith.maximumf %4, %cst_1 : f32
    %6 = arith.addf %1, %3 : f32
    %7 = arith.addf %6, %5 : f32
    %cst_2 = arith.constant 1.000000e+00 : f32
    %8 = arith.divf %cst_2, %7 : f32
    %c0_3 = arith.constant 0 : index
    %c0_4 = arith.constant 0 : index
    %c0_5 = arith.constant 0 : index
    %9 = vector.load %arg2[%c0_3, %c0_4, %c0_5] : memref<3x16x128xf32, #tpu.memory_space<vmem>>, vector<1x16x128xf32>
    %10 = vector.shape_cast %9 : vector<1x16x128xf32> to vector<16x128xf32>
    %11 = arith.mulf %1, %8 : f32
    %12 = vector.broadcast %11 : f32 to vector<16x128xf32>
    %13 = arith.mulf %10, %12 : vector<16x128xf32>
    %c1_6 = arith.constant 1 : index
    %c0_7 = arith.constant 0 : index
    %c0_8 = arith.constant 0 : index
    %14 = vector.load %arg2[%c1_6, %c0_7, %c0_8] : memref<3x16x128xf32, #tpu.memory_space<vmem>>, vector<1x16x128xf32>
    %15 = vector.shape_cast %14 : vector<1x16x128xf32> to vector<16x128xf32>
    %16 = arith.mulf %3, %8 : f32
    %17 = vector.broadcast %16 : f32 to vector<16x128xf32>
    %18 = arith.mulf %15, %17 : vector<16x128xf32>
    %19 = arith.addf %13, %18 : vector<16x128xf32>
    %c2_9 = arith.constant 2 : index
    %c0_10 = arith.constant 0 : index
    %c0_11 = arith.constant 0 : index
    %20 = vector.load %arg2[%c2_9, %c0_10, %c0_11] : memref<3x16x128xf32, #tpu.memory_space<vmem>>, vector<1x16x128xf32>
    %21 = vector.shape_cast %20 : vector<1x16x128xf32> to vector<16x128xf32>
    %22 = arith.mulf %5, %8 : f32
    %23 = vector.broadcast %22 : f32 to vector<16x128xf32>
    %24 = arith.mulf %21, %23 : vector<16x128xf32>
    %25 = arith.addf %19, %24 : vector<16x128xf32>
    %c0_12 = arith.constant 0 : index
    %c0_13 = arith.constant 0 : index
    %26 = vector.load %arg3[%c0_12, %c0_13] : memref<16x128xf32, #tpu.memory_space<vmem>>, vector<16x128xf32>
    tpu.vector_store %arg3[%c0_12, %c0_13], %25 {strides = array<i32>} : memref<16x128xf32, #tpu.memory_space<vmem>>, vector<16x128xf32>,
    return
  }
  func.func @transform_0(%arg0: i32) -> i32 {
    %c0_i32 = arith.constant 0 : i32
    %c0_i32_0 = arith.constant 0 : i32
    return %c0_i32 : i32
  }
  func.func @transform_1(%arg0: i32) -> (i32, i32, i32) {
    %c0_i32 = arith.constant 0 : i32
    %c0_i32_0 = arith.constant 0 : i32
    %c0_i32_1 = arith.constant 0 : i32
    return %c0_i32, %arg0, %c0_i32_0 : i32, i32, i32
  }
  func.func @transform_2(%arg0: i32) -> (i32, i32) {
    %c0_i32 = arith.constant 0 : i32
    %c0_i32_0 = arith.constant 0 : i32
    return %arg0, %c0_i32 : i32, i32
  }
}

</mosaic_0001>

<bundles_post_ra>
// kernel: tpu_custom_call.1
= control target key start
LH: loop header
LB: loop body
LE: loop exit
PB: predicated region body
PF: predicated region fallthrough
CT: control target
= control target key end

     0   :  { %7 = vsyncpa [#allocation5], 0  ;;  %s194_s0 = inlined_call_operand.hbm [shape: f32[3], index: 0, kind: input, shape index: {}]   ;;  %s195_s1 = inlined_call_operand.hbm [shape: f32[3,16,128], index: 1, kind: input, shape index: {}]   ;;  %s196_s2 = inlined_call_operand.hbm [shape: f32[16,128], index: 2, kind: output, shape index: {}]  }
   0x1   :  { %8 = vsyncpa [#allocation3], 0 }
   0x2   :  { %9 = vsyncpa [#allocation4], 0  ;;  %s158_s9 = smov [#allocation2]   ;;  %s159_s12 = smov [#allocation6]  }
   0x3   :  { %17 = dma.hbm_to_smem %s194_s0, 16, %s158_s9, [#allocation5]  }
   0x4   :  { %s23_s13 = sshll.u32 %s159_s12, 4  ;;  %s24_s13 = int_to_ptr.vmem [resolvable:$true] %s23_s13 }
   0x5   :  { %s120_s14 = scalar_lea.vmem %s24_s13, 768  ;;  %p125_p1 = scmp.lt.s32.totalorder %s24_s13, %s24_s13 }
   0x6   :  { %p121_p0 = scmp.ne.s32.totalorder %s24_s13, %s120_s14  ;;  %p126_p2 = scmp.lt.s32.totalorder %s120_s14, %s120_s14 }
   0x8   :  { %p127_p3 = por %p126_p2, %p125_p1 }
   0xa   :  { %p128_p4 = pnand %p127_p3, %p121_p0 }
   0xc   :  { %131 = shalt.err (!%p128_p4)
}
   0xd   :  { %s160_s15 = smov 128   ;;  %s161_s16 = smov 8  }
   0xe   :  { %29 = dma.hbm_to_vmem [thread:$0]  %s195_s1, 768, %s24_s13, [#allocation3], %s160_s15, %s160_s15, %s161_s16  }
   0xf   :  { %152 = dma.done.wait [#allocation5], 16  }
  0x10   :  { %153 = vsyncadd [#allocation5], 4294967280 }
  0x11   :  { %154 = dma.done.wait [#allocation3], 768  }
  0x12   :  { %155 = vsyncadd [#allocation3], 4294966528 }
  0x13   :  { %36 = sfence }
  0x14   :  { %s37_s0 = sld [smem:[#allocation2]]  ;;  %s162_s21 = smov 0.0   ;;  %v48_v2 = vld [vmem:[#allocation6] sm:$0xff]  ;;  %v49_v3 = vld [vmem:[#allocation6 + $0x8] sm:$0xff]  ;;  %v55_v4 = vld [vmem:[#allocation6 + $0x10] sm:$0xff] }
  0x15   :  { %s92_s19 = sld [smem:[#allocation2 + $0x1]]  ;;  %v56_v5 = vld [vmem:[#allocation6 + $0x18] sm:$0xff]  ;;  %v64_v10 = vld [vmem:[#allocation6 + $0x20] sm:$0xff]  ;;  %v65_v11 = vld [vmem:[#allocation6 + $0x28] sm:$0xff]  ;;  %s163_s30 = smov [#allocation7]  }
  0x16   :  { %s93_s20 = sld [smem:[#allocation2 + $0x2]]  ;;  %s79_s3 = sshll.u32 %s163_s30, 4  ;;  %s80_s3 = int_to_ptr.vmem [resolvable:$true] %s79_s3 }
  0x17   :  { %s132_s4 = scalar_lea.vmem %s80_s3, 256  ;;  %p137_p6 = scmp.lt.s32.totalorder %s80_s3, %s80_s3 }
  0x18   :  { %p133_p5 = scmp.ne.s32.totalorder %s80_s3, %s132_s4  ;;  %p138_p7 = scmp.lt.s32.totalorder %s132_s4, %s132_s4 }
  0x1a   :  { %s38_s22 = smax.f32 %s162_s21, %s37_s0  ;;  %p139_p8 = por %p138_p7, %p137_p6 }
  0x1b   :  { %s40_s23 = smax.f32 %s162_s21, %s92_s19 }
  0x1c   :  { %s42_s24 = smax.f32 %s162_s21, %s93_s20  ;;  %s43_s25 = sadd.f32 %s40_s23, %s38_s22 }
  0x1d   :  { %p140_p9 = pnand %p139_p8, %p133_p5 }
  0x1e   :  { %s44_s26 = sadd.f32 %s43_s25, %s42_s24 }
  0x20   :  { %v45_v0 = vstv %s44_s26 }
  0x21   :  { %102 = vrcp.f32 %v45_v0 }
  0x2e   :  { %v103_v1 = vpop.eup %102 }
  0x2f   :  { %94 = vpush %v103_v1 }
  0x60   :  { %s95_s27 = spop %94 }
  0x61   :  { %s50_s1 = smul.f32 %s95_s27, %s38_s22 }
  0x62   :  { %s57_s28 = smul.f32 %s95_s27, %s40_s23 }
  0x63   :  { %v51_v6 = vstv %s50_s1  ;;  %s66_s29 = smul.f32 %s95_s27, %s42_s24 }
  0x64   :  { %v52_v7 = vmul.f32 %v51_v6, %v48_v2  ;;  %v53_v8 = vmul.f32 %v51_v6, %v49_v3  ;;  %v58_v9 = vstv %s57_s28 }
  0x65   :  { %v59_v12 = vmul.f32 %v58_v9, %v55_v4  ;;  %v60_v13 = vmul.f32 %v58_v9, %v56_v5  ;;  %v67_v14 = vstv %s66_s29 }
  0x66   :  { %v68_v15 = vmul.f32 %v67_v14, %v64_v10  ;;  %v69_v16 = vmul.f32 %v67_v14, %v65_v11 }
  0x67   :  { %v61_v17 = vadd.f32 %v59_v12, %v52_v7  ;;  %v62_v18 = vadd.f32 %v60_v13, %v53_v8 }
  0x69   :  { %v70_v19 = vadd.f32 %v68_v15, %v61_v17  ;;  %v71_v20 = vadd.f32 %v69_v16, %v62_v18 }
  0x6b   :  { %72 = vst [vmem:[#allocation7] sm:$0xff] %v70_v19  ;;  %73 = vst [vmem:[#allocation7 + $0x8] sm:$0xff] %v71_v20 }
  0x6c   :  { %143 = shalt.err (!%p140_p9)
}
  0x6d   :  { %85 = dma.vmem_to_hbm [thread:$0]  %s80_s3, 256, %s196_s2, [#allocation4], %s160_s15, %s160_s15, %s161_s16  }
  0x6e   :  { %156 = dma.done.wait [#allocation4], 256  }
  0x6f   :  { %157 = vsyncadd [#allocation4], 4294967040 }
  0x70   :  { %89 = vsyncpa [#allocation3], 1 }
  0x71   :  { %90 = vsyncpa [#allocation4], 1 }
  0x72   :  { %91 = vsyncpa [#allocation5], 1 }

</bundles_post_ra>
